<compile_context>
chip_gen: v7x
topology: tpu7x:2x2x1
jax: 0.10.0
libtpu: 0.0.40
codegen_flags: <defaults>
</compile_context>

<pallas_src>
import jax
import jax.numpy as jnp
from jax.experimental import pallas as pl
from jax.experimental.pallas import tpu as pltpu


def se_block_kernel(x_ref, w1_ref, w2_ref, o_ref):
    """x_ref/o_ref: (N_blk, C, L). w1_ref: (H, C) = fc1.weight. w2_ref: (C, H) = fc2.weight."""
    x = x_ref[...].astype(jnp.float32)                       # (N_blk, C, L), lane-dense in L

    # --- squeeze: global average pool over L (one cross-lane reduce -> XLU) ---
    inv_l = jnp.float32(1.0 / x.shape[-1])
    pooled = jnp.sum(x, axis=-1) * inv_l                     # (N_blk, C)

    # --- excitation: two tiny FCs as single batched contractions (no per-h Python loop,
    #     no serialized chain of XLU reduces; reductions stay on the lane axis) ---
    w1 = w1_ref[...].astype(jnp.float32)                     # (H, C)
    w2 = w2_ref[...].astype(jnp.float32)                     # (C, H)
    z = jnp.sum(pooled[:, None, :] * w1[None, :, :], axis=-1)    # (N_blk, H)
    z = jnp.maximum(z, 0.0)                                       # ReLU
    g = jnp.sum(z[:, None, :] * w2[None, :, :], axis=-1)         # (N_blk, C)
    g = jax.nn.sigmoid(g)                                         # EUP

    # --- scale: channel gate broadcast along the lane-dense L axis.
    # Re-read x from VMEM (vld is not the bottleneck) instead of forcing the earlier load
    # to stay live across the excitation math.
    o_ref[...] = (x_ref[...].astype(jnp.float32) * g[:, :, None]).astype(o_ref.dtype)


def _pick_batch_block(n, bytes_per_batch_elem, *, target_block_bytes=4 << 20, min_grid_steps=8):
    """Batch elements per grid step: as large as the ~4 MiB block budget allows, but never so
    large that the grid drops below `min_grid_steps` (needed for pipelining / megacore split),
    and always a divisor of n."""
    max_by_bytes = max(1, target_block_bytes // bytes_per_batch_elem)
    max_by_grid = max(1, n // min_grid_steps)
    cap = max(1, min(n, max_by_bytes, max_by_grid))
    for nb in range(cap, 0, -1):
        if n % nb == 0:
            return nb
    return 1


def se_block(x, fc1_weight, fc2_weight, *, n_blk=None):
    """SEBlock forward.

    x:          (N, C, L), float32 or bfloat16 (compute is f32 in-kernel either way)
    fc1_weight: (H, C) = nn.Linear(C, C//reduction, bias=False).weight
    fc2_weight: (C, H) = nn.Linear(C//reduction, C, bias=False).weight
    """
    N, C, L = x.shape
    H, C1 = fc1_weight.shape
    assert C1 == C and fc2_weight.shape == (C, H), "weight shapes must match SEBlock(C, C//r)"
    # Perf note (not a correctness issue): best layouts need C % 8 == 0 (16 for bf16) and
    # L % 128 == 0; otherwise stores become masked vst.msk and vregs are padded.

    itemsize = jnp.dtype(x.dtype).itemsize
    per_elem_bytes = C * L * itemsize
    if n_blk is None:
        n_blk = _pick_batch_block(N, per_elem_bytes)
    assert N % n_blk == 0, "batch must be divisible by the batch block size"
    grid = (N // n_blk,)

    block_bytes = n_blk * per_elem_bytes
    weight_bytes = 2 * H * C * jnp.dtype(fc1_weight.dtype).itemsize
    # VMEM budget: double-buffered x-in + double-buffered out + resident weights.
    vmem_needed = 4 * block_bytes + weight_bytes
    # TODO(synk): if C*L is so large that even n_blk=1 exceeds this budget (first broken on
    # v7x's 64 MiB VMEM), add a two-pass L-tiled path: a streaming pool kernel producing the
    # (N, C) gate, then a streaming gated-multiply kernel with a 2D (batch, L-tile) grid.
    assert vmem_needed <= (24 << 20), (
        f"SE block of {block_bytes >> 20} MiB per step needs an L-tiled two-pass fallback")
    # Raise the scoped VMEM limit (v5e default is 16 MiB); stay well under v7x's 64 MiB.
    vmem_limit = int(min(max(32 << 20, 2 * vmem_needed), 56 << 20))

    io_bytes = 2 * N * C * L * itemsize + 2 * weight_bytes        # x in + out + both weights
    flops = 2 * N * C * L + 4 * N * H * C                          # pool + gate mul + 2 FCs
    cost = pl.CostEstimate(flops=int(flops), transcendentals=int(N * C),
                           bytes_accessed=int(io_bytes))

    return pl.pallas_call(
        se_block_kernel,
        out_shape=jax.ShapeDtypeStruct((N, C, L), x.dtype),
        grid=grid,
        in_specs=[
            pl.BlockSpec((n_blk, C, L), lambda i: (i, 0, 0)),     # batch block of x
            pl.BlockSpec((H, C), lambda i: (0, 0)),               # fc1 weight (resident)
            pl.BlockSpec((C, H), lambda i: (0, 0)),               # fc2 weight (resident)
        ],
        out_specs=pl.BlockSpec((n_blk, C, L), lambda i: (i, 0, 0)),
        compiler_params=pltpu.CompilerParams(
            dimension_semantics=("parallel",),
            vmem_limit_bytes=vmem_limit,
        ),
        cost_estimate=cost,
    )(x, fc1_weight, fc2_weight)


def reference(x, fc1_weight, fc2_weight):
    """Plain-JAX reference for the PyTorch SEBlock forward (f32 compute)."""
    xf = x.astype(jnp.float32)
    y = jnp.mean(xf, axis=-1)                              # (N, C)  -- AdaptiveAvgPool1d(1)
    y = jax.nn.relu(y @ fc1_weight.astype(jnp.float32).T)  # (N, H)
    y = jax.nn.sigmoid(y @ fc2_weight.astype(jnp.float32).T)  # (N, C)
    return xf * y[:, :, None]


if __name__ == "__main__":
    # Small, lane-dense shapes consistent with the module: L=128 fills the lane axis; C=32
    # with the default reduction=16 gives H=2 hidden units. N=16 lets the auto block sizing
    # pick n_blk=2 -> grid=(8,): even, >= 8 pipelined steps, splits cleanly across 2 TCs.
    N, C, L, reduction = 16, 32, 128, 16
    H = C // reduction

    key = jax.random.PRNGKey(0)
    kx, k1, k2 = jax.random.split(key, 3)
    x = jax.random.normal(kx, (N, C, L), dtype=jnp.float32)
    fc1_w = (0.1 * jax.random.normal(k1, (H, C))).astype(jnp.float32)
    fc2_w = (0.1 * jax.random.normal(k2, (C, H))).astype(jnp.float32)

    # f32 path
    out = jax.block_until_ready(se_block(x, fc1_w, fc2_w))
    ref = jax.block_until_ready(reference(x, fc1_w, fc2_w))
    assert out.shape == (N, C, L)
    assert jnp.allclose(out, ref, rtol=1e-5, atol=1e-5), \
        f"f32 max abs err {jnp.max(jnp.abs(out - ref))}"

    # bf16 I/O path (compute still f32 in-kernel): halves HBM traffic on this mem-bound op.
    x_bf = x.astype(jnp.bfloat16)
    out_bf = jax.block_until_ready(se_block(x_bf, fc1_w, fc2_w))
    ref_bf = reference(x_bf, fc1_w, fc2_w)                  # f32 reference from bf16 input
    assert out_bf.dtype == jnp.bfloat16
    assert jnp.allclose(out_bf.astype(jnp.float32), ref_bf, rtol=2e-2, atol=5e-2), \
        f"bf16 max abs err {jnp.max(jnp.abs(out_bf.astype(jnp.float32) - ref_bf))}"

    print("KERNEL_OK")
</pallas_src>

<mosaic_0001>
module attributes {stable_mosaic.version = 11 : i64} {
  func.func @se_block_kernel(%arg0: i32, %arg1: memref<2x32x128xf32, #tpu.memory_space<vmem>>, %arg2: memref<2x32xf32, #tpu.memory_space<vmem>>, %arg3: memref<32x2xf32, #tpu.memory_space<vmem>>, %arg4: memref<2x32x128xf32, #tpu.memory_space<vmem>>) attributes {dimension_semantics = [#tpu.dimension_semantics<parallel>], iteration_bounds = array<i64: 8>, scalar_prefetch = 0 : i64, scratch_operands = 0 : i64, tpu.core_type = #tpu.core_type<tc>, window_params = [{transform_indices = @transform_0, window_bounds = array<i64: 2, 32, 128>}, {pipeline_mode = #tpu.pipeline_mode<synchronous>, transform_indices = @transform_1, window_bounds = array<i64: 2, 32>}, {pipeline_mode = #tpu.pipeline_mode<synchronous>, transform_indices = @transform_2, window_bounds = array<i64: 32, 2>}, {transform_indices = @transform_3, window_bounds = array<i64: 2, 32, 128>}]} {
    %c0 = arith.constant 0 : index
    %c0_0 = arith.constant 0 : index
    %c0_1 = arith.constant 0 : index
    %0 = vector.load %arg1[%c0, %c0_0, %c0_1] : memref<2x32x128xf32, #tpu.memory_space<vmem>>, vector<2x32x128xf32>
    %cst = arith.constant dense<0.000000e+00> : vector<2x32xf32>
    %1 = vector.multi_reduction <add>, %0, %cst [2] : vector<2x32x128xf32> to vector<2x32xf32>
    %cst_2 = arith.constant 7.812500e-03 : f32
    %2 = vector.broadcast %cst_2 : f32 to vector<2x32xf32>
    %3 = arith.mulf %1, %2 : vector<2x32xf32>
    %c0_3 = arith.constant 0 : index
    %c0_4 = arith.constant 0 : index
    %4 = vector.load %arg2[%c0_3, %c0_4] : memref<2x32xf32, #tpu.memory_space<vmem>>, vector<2x32xf32>
    %c0_5 = arith.constant 0 : index
    %c0_6 = arith.constant 0 : index
    %5 = vector.load %arg3[%c0_5, %c0_6] : memref<32x2xf32, #tpu.memory_space<vmem>>, vector<32x2xf32>
    %6 = vector.shape_cast %3 : vector<2x32xf32> to vector<2x1x32xf32>
    %7 = vector.shape_cast %4 : vector<2x32xf32> to vector<1x2x32xf32>
    %8 = vector.broadcast %6 : vector<2x1x32xf32> to vector<2x2x32xf32>
    %9 = vector.broadcast %7 : vector<1x2x32xf32> to vector<2x2x32xf32>
    %10 = arith.mulf %8, %9 : vector<2x2x32xf32>
    %cst_7 = arith.constant dense<0.000000e+00> : vector<2x2xf32>
    %11 = vector.multi_reduction <add>, %10, %cst_7 [2] : vector<2x2x32xf32> to vector<2x2xf32>
    %cst_8 = arith.constant 0.000000e+00 : f32
    %12 = vector.broadcast %cst_8 : f32 to vector<2x2xf32>
    %13 = arith.maximumf %11, %12 : vector<2x2xf32>
    %14 = vector.shape_cast %13 : vector<2x2xf32> to vector<2x1x2xf32>
    %15 = vector.shape_cast %5 : vector<32x2xf32> to vector<1x32x2xf32>
    %16 = vector.broadcast %14 : vector<2x1x2xf32> to vector<2x32x2xf32>
    %17 = vector.broadcast %15 : vector<1x32x2xf32> to vector<2x32x2xf32>
    %18 = arith.mulf %16, %17 : vector<2x32x2xf32>
    %cst_9 = arith.constant dense<0.000000e+00> : vector<2x32xf32>
    %19 = vector.multi_reduction <add>, %18, %cst_9 [2] : vector<2x32x2xf32> to vector<2x32xf32>
    %20 = arith.negf %19 : vector<2x32xf32>
    %21 = math.exp %20 : vector<2x32xf32>
    %cst_10 = arith.constant 1.000000e+00 : f32
    %22 = vector.broadcast %cst_10 : f32 to vector<2x32xf32>
    %23 = arith.addf %22, %21 : vector<2x32xf32>
    %24 = arith.divf %22, %23 : vector<2x32xf32>
    %c0_11 = arith.constant 0 : index
    %c0_12 = arith.constant 0 : index
    %c0_13 = arith.constant 0 : index
    %25 = vector.load %arg1[%c0_11, %c0_12, %c0_13] : memref<2x32x128xf32, #tpu.memory_space<vmem>>, vector<2x32x128xf32>
    %26 = vector.shape_cast %24 : vector<2x32xf32> to vector<2x32x1xf32>
    %27 = vector.broadcast %26 : vector<2x32x1xf32> to vector<2x32x128xf32>
    %28 = arith.mulf %25, %27 : vector<2x32x128xf32>
    %c0_14 = arith.constant 0 : index
    %c0_15 = arith.constant 0 : index
    %c0_16 = arith.constant 0 : index
    %29 = vector.load %arg4[%c0_14, %c0_15, %c0_16] : memref<2x32x128xf32, #tpu.memory_space<vmem>>, vector<2x32x128xf32>
    tpu.vector_store %arg4[%c0_14, %c0_15, %c0_16], %28 {strides = array<i32>} : memref<2x32x128xf32, #tpu.memory_space<vmem>>, vector<2x32x128xf32>,
    return
  }
  func.func @transform_0(%arg0: i32) -> (i32, i32, i32) {
    %c0_i32 = arith.constant 0 : i32
    %c0_i32_0 = arith.constant 0 : i32
    %c0_i32_1 = arith.constant 0 : i32
    return %arg0, %c0_i32, %c0_i32_0 : i32, i32, i32
  }
  func.func @transform_1(%arg0: i32) -> (i32, i32) {
    %c0_i32 = arith.constant 0 : i32
    %c0_i32_0 = arith.constant 0 : i32
    %c0_i32_1 = arith.constant 0 : i32
    return %c0_i32, %c0_i32_0 : i32, i32
  }
  func.func @transform_2(%arg0: i32) -> (i32, i32) {
    %c0_i32 = arith.constant 0 : i32
    %c0_i32_0 = arith.constant 0 : i32
    %c0_i32_1 = arith.constant 0 : i32
    return %c0_i32, %c0_i32_0 : i32, i32
  }
  func.func @transform_3(%arg0: i32) -> (i32, i32, i32) {
    %c0_i32 = arith.constant 0 : i32
    %c0_i32_0 = arith.constant 0 : i32
    %c0_i32_1 = arith.constant 0 : i32
    return %arg0, %c0_i32, %c0_i32_0 : i32, i32, i32
  }
}

</mosaic_0001>

<bundles_post_ra>
// kernel: tpu_custom_call.1
= control target key start
LH: loop header
LB: loop body
LE: loop exit
PB: predicated region body
PF: predicated region fallthrough
CT: control target
= control target key end

     0   :  { %8 = vsyncpa [#allocation3], 0  ;;  %s2430_s0 = inlined_call_operand.hbm [shape: f32[16,32,128], index: 0, kind: input, shape index: {}]   ;;  %s2431_s1 = inlined_call_operand.vmem [shape: f32[2,32], index: 1, kind: input, shape index: {}]   ;;  %s2432_s2 = inlined_call_operand.vmem [shape: f32[32,2], index: 2, kind: input, shape index: {}]   ;;  %s2433_s3 = inlined_call_operand.hbm [shape: f32[16,32,128], index: 3, kind: output, shape index: {}]  }
   0x1   :  { %10 = vsyncpa [#allocation3 + $0x1], 0 }
   0x2   :  { %11 = vsyncpa [#allocation4], 0 }
   0x3   :  { %13 = vsyncpa [#allocation4 + $0x1], 0  ;;  %s1783_s12 = smov 0   ;;  %s1785_s13 = smov 0  }
   0x4   :  { %s1787_s14 = smov 0   ;;  %s1789_s15 = smov 0  }
   0x5 LB: > { %s1804_s16 = sadd.s32 4294967295, %s1754_s15   ;;  %s1537_s17 = sadd.s32 4294967294, %s1754_s15   ;;  %s1754_s15 = sphi %s1789_s15, %s2445_s15   ;;  %s1750_s14 = sphi %s1787_s14, %s2444_s14   ;;  %s1746_s13 = sphi %s1785_s13, %s2443_s13   ;;  %s1742_s12 = sphi %s1783_s12, %s2442_s12  }
   0x6   : > { %s1808_s18 = sadd.s32 1, %s1754_s15   ;;  %s26_s19 = sadd.s32 1, %s1750_s14 }
   0x7   : > { %s23_s20 = ssub.s32 %s1754_s15, %s1808_s18  ;;  %p33_p0 = scmp.ne.s32.totalorder %s1750_s14, %s1746_s13 }
   0x8   : > { %p24_p1 = scmp.eq.s32.totalorder %s23_s20, 0  ;;  %p34_p2 = scmp.eq.s32.totalorder %s1754_s15, 0 }
   0x9   : > { %p39_p3 = scmp.ne.s32.totalorder %s1746_s13, %s1742_s12  ;;  %p40_p4 = scmp.eq.s32.totalorder %s1804_s16, 0 }
   0xa   : > { %s1820_s21 = scalar_select %p24_p1, %s1750_s14, %s26_s19  }
   0xb   : > { %p1822_p5 = por %p34_p2, %p33_p0  ;;  %p1826_p6 = por %p40_p4, %p39_p3 }
   0xc   : > { %p105_p7 = scmp.eq.s32.totalorder %s1804_s16, 7  ;;  %p111_p8 = scmp.eq.s32.totalorder %s1537_s17, 7 }
   0xd   : > { %p1577_p9 = scmp.lt.s32.totalorder %s1754_s15, 8  ;;  %s137_s26 = sand.u32 1, %s1750_s14  }
   0xe   : > { %p1832_p10 = por %p105_p7, %p33_p0  ;;  %p1836_p11 = por %p111_p8, %p39_p3 }
   0xf   : > { %s1562_s27 = sshll.u32 %s1754_s15, 10  ;;  %s1540_s28 = sshll.u32 %s137_s26, 6 }
  0x10   : > { %s2437_s24 = scalar_select %p1832_p10, 1, 0 }
  0x11   : > { %s2438_s25 = scalar_select %p1836_p11, 1, 0 }
  0x12   : > { %s1845_s4 = scalar_lea.hbm %s2430_s0, %s1562_s27  ;;  %s141_s5 = scalar_lea.vmem [#allocation2], %s1540_s28 }
  0x13   : > { %s149_s6 = sshll.u32 %s141_s5, 4  ;;  %p1849_p12 = pnand %p1577_p9, %p1822_p5  ;;  %s1853_s6 = int_to_ptr.vmem [resolvable:$true] %s149_s6 }
  0x14   : > { %s1855_s8 = scalar_lea.sflag [#allocation3], %s137_s26  ;;  %s1658_s9 = scalar_lea.hbm %s1845_s4, 1024 }
  0x15   : > { %p1659_p13 = scmp.ne.s32.totalorder %s1845_s4, %s1658_s9  ;;  %p1660_p0 = pneg %p1849_p12 }
  0x16   : > { %s1663_s17 = scalar_lea.hbm %s2430_s0, 8192  ;;  %p1664_p3 = scmp.lt.u32.totalorder %s1845_s4, %s2430_s0 }
  0x17   : > { %p1661_p1 = pnand %p1660_p0, %p1659_p13  ;;  %p1665_p4 = scmp.lt.u32.totalorder %s1663_s17, %s1658_s9 }
  0x18   : > { %p1667_p7 = scmp.lt.u32.totalorder %s1658_s9, %s1845_s4 }
  0x19   : > { %p1662_p2 = pneg %p1661_p1  ;;  %p1666_p5 = por %p1665_p4, %p1664_p3 }
  0x1b   : > { %p1668_p8 = por %p1667_p7, %p1666_p5 }
  0x1d   : > { %p1669_p9 = pnand %p1668_p8, %p1662_p2 }
  0x1f   : > { %1672 = shalt.err (!%p1669_p9)
}
  0x20   : > { %s1673_s22 = scalar_lea.vmem %s1853_s6, 1024  ;;  %s1756_s26 = smov [#allocation2]  }
  0x21   : > { %p1674_p13 = scmp.ne.s32.totalorder %s1853_s6, %s1673_s22  ;;  %s1678_s27 = sshll.u32 %s1756_s26, 4  ;;  %s1679_s27 = int_to_ptr.vmem [resolvable:$false] %s1678_s27 }
  0x22   : > { %s1680_s28 = scalar_lea.vmem %s1679_s27, 2048  ;;  %p1681_p10 = scmp.lt.s32.totalorder %s1853_s6, %s1679_s27 }
  0x23   : > { %p1676_p1 = pnand %p1674_p13, %p1660_p0  ;;  %p1682_p3 = scmp.lt.s32.totalorder %s1680_s28, %s1673_s22 }
  0x25   : > { %p1677_p11 = pneg %p1676_p1  ;;  %p1683_p4 = por %p1682_p3, %p1681_p10 }
  0x27   : > { %p1684_p5 = pnand %p1683_p4, %p1677_p11 }
  0x29   : > { %1687 = shalt.err (!%p1684_p5)
}
  0x2a   : > { %s1757_s29 = smov 128   ;;  %s1758_s30 = smov 8  }
  0x2b   : > { %1572 = dma.hbm_to_vmem [thread:$0]  (!%p1849_p12), %s1845_s4, 1024, %s1853_s6, %s1855_s8, %s1757_s29, %s1757_s29, %s1758_s30  }
  0x2c   : > { %p1544_p0 = scmp.ge.s32.totalorder %s1754_s15, 1  ;;  %p157_p2 = scmp.lt.s32.totalorder %s1754_s15, 9 }
  0x2e   : > { %p158_p7 = pnand %p1544_p0, %p157_p2 }
  0x2f   : > { %s1886_s5 = sand.u32 (!%p158_p7), 1, %s1746_s13  }
  0x30   : > { %161 = sbr.rel (%p158_p7) target bundleno = 954 (0x3ba), region = 32  ;;  %s1545_s9 = sshll.u32 (!%p158_p7), %s1886_s5, 6 }
  0x31   : > { %s164_s10 = scalar_lea.sflag (!%p158_p7), [#allocation3], %s1886_s5  ;;  %s1892_s11 = scalar_lea.vmem (!%p158_p7), [#allocation2], %s1545_s9 }
  0x37   : > { %1733 = dma.done.wait (%p1826_p6), %s164_s10, 1024  }
  0x38   : > { %1735 = vsyncadd (%p1826_p6), %s164_s10, 4294966272  ;;  %v194_v0 = vld [vmem:[%s1892_s11 + $0x10] sm:$0xff]  ;;  %v192_v1 = vld [vmem:[%s1892_s11] sm:$0xff]  ;;  %v230_v8 = vlaneseq  ;;  %v1759_v14 = vmov 0   ;;  %vm367_vm0 = vcmask 130112   ;;  %vm374_vm1 = vcmask 195712  }
  0x39   : > { %204 = vadd.xlane.f32.xlu1 %v194_v0  ;;  %200 = vadd.xlane.f32.xlu0 %v192_v1  ;;  %v195_v2 = vld [vmem:[%s1892_s11 + $0x18] sm:$0xff]  ;;  %v193_v3 = vld [vmem:[%s1892_s11 + $0x8] sm:$0xff]  ;;  %v196_v5 = vld [vmem:[%s1892_s11 + $0x20] sm:$0xff]  ;;  %vm381_vm2 = vcmask 261312   ;;  %vm440_vm3 = vcmask 1041409   ;;  %vm445_vm4 = vcmask 254976  }
  0x3a   : > { %v197_v4 = vld [vmem:[%s1892_s11 + $0x28] sm:$0xff]  ;;  %v199_v6 = vld [vmem:[%s1892_s11 + $0x38] sm:$0xff]  ;;  %v198_v7 = vld [vmem:[%s1892_s11 + $0x30] sm:$0xff]  ;;  %v1907_v9 = vshrl.u32 %v230_v8, 7  ;;  %1617 = vset.pattern.permute.xlu1 %v1759_v14  ;;  %1616 = vset.pattern.permute.xlu0 %v1759_v14  ;;  %vm1291_vm5 = vcmask 1042434   ;;  %vm1293_vm6 = vcmask 1043459  }
  0x3b   : > { %v224_v11 = vld [vmem:[%s2431_s1] sm:$0x3]  ;;  %v226_v31 = vld [vmem:[%s2432_s2 + $0x8] sm:$0xff]  ;;  %v227_v40 = vld [vmem:[%s2432_s2 + $0x10] sm:$0xff]  ;;  %vm1295_vm7 = vcmask 1044484   ;;  %vm1297_vm8 = vcmask 1045509  }
  0x3c   : > { %v1910_v10 = vsub.s32 0, %v1907_v9  ;;  %v1917_v13 = vsub.s32 1, %v1907_v9  ;;  %v225_v16 = vld [vmem:[%s2432_s2] sm:$0xff]  ;;  %v1925_v18 = vsub.s32 3, %v1907_v9  ;;  %v474_v20 = vsub.s32 2, %v1907_v9  ;;  %v1964_v49 = vld [vmem:[%s2432_s2 + $0x18] sm:$0xff] }
  0x3d   : > { %206 = vadd.xlane.f32.xlu1 %v195_v2  ;;  %202 = vadd.xlane.f32.xlu0 %v193_v3  ;;  %v1931_v22 = vsub.s32 5, %v1907_v9  ;;  %v488_v24 = vsub.s32 4, %v1907_v9  ;;  %v1936_v26 = vsub.s32 7, %v1907_v9  ;;  %v1939_v28 = vsub.s32 6, %v1907_v9  ;;  %s2364_s27 = scalar_lea.vmem [#allocation5], %s1545_s9  ;;  %s1564_s28 = sshll.u32 %s1804_s16, 10 }
  0x3e   : > { %v233_v12 = vrot.slane %v224_v11, %v1910_v10  ;;  %v252_v15 = vrot.slane %v224_v11, %v1917_v13  ;;  %v461_v17 = vrot.slane %v225_v16, %v1910_v10  ;;  %v468_v19 = vrot.slane %v225_v16, %v1917_v13  ;;  %s1464_s29 = sshll.u32 %s2364_s27, 4  ;;  %s2382_s10 = scalar_lea.hbm %s2433_s3, %s1564_s28  ;;  %s2384_s29 = int_to_ptr.vmem [resolvable:$true] %s1464_s29 }
  0x3f   : > { %v482_v21 = vrot.slane %v225_v16, %v1925_v18  ;;  %v475_v23 = vrot.slane %v225_v16, %v474_v20  ;;  %v496_v25 = vrot.slane %v225_v16, %v1931_v22  ;;  %v489_v27 = vrot.slane %v225_v16, %v488_v24  ;;  %s1450_s16 = scalar_lea.sflag [#allocation4], %s1886_s5  ;;  %s1688_s23 = scalar_lea.vmem %s2384_s29, 1024 }
  0x40   : > { %v510_v29 = vrot.slane %v225_v16, %v1936_v26  ;;  %v503_v30 = vrot.slane %v225_v16, %v1939_v28  ;;  %v524_v32 = vrot.slane %v226_v31, %v1917_v13  ;;  %v517_v33 = vrot.slane %v226_v31, %v1910_v10  ;;  %p1689_p6 = scmp.ne.s32.totalorder %s2384_s29, %s1688_s23  ;;  %p2440_p10 = scmp.ne.s32.totalorder %s2437_s24, 0 }
  0x41   : > { %210 = vadd.xlane.f32.xlu1 %v197_v4  ;;  %208 = vadd.xlane.f32.xlu0 %v196_v5  ;;  %v538_v34 = vrot.slane %v226_v31, %v1925_v18  ;;  %v531_v35 = vrot.slane %v226_v31, %v474_v20  ;;  %v552_v36 = vrot.slane %v226_v31, %v1931_v22  ;;  %vm1299_vm9 = vcmask 1046534   ;;  %s1760_s4 = smov [#allocation5]  }
  0x42   : > { %v545_v37 = vrot.slane %v226_v31, %v488_v24  ;;  %v566_v38 = vrot.slane %v226_v31, %v1936_v26  ;;  %v559_v39 = vrot.slane %v226_v31, %v1939_v28  ;;  %v580_v41 = vrot.slane %v227_v40, %v1917_v13  ;;  %p1690_p11 = pnand %p1689_p6, %p2440_p10  ;;  %s1692_s6 = sshll.u32 %s1760_s4, 4  ;;  %s1693_s6 = int_to_ptr.vmem [resolvable:$false] %s1692_s6 }
  0x43   : > { %v573_v42 = vrot.slane %v227_v40, %v1910_v10  ;;  %v594_v43 = vrot.slane %v227_v40, %v1925_v18  ;;  %v587_v44 = vrot.slane %v227_v40, %v474_v20  ;;  %v608_v45 = vrot.slane %v227_v40, %v1931_v22  ;;  %s1694_s7 = scalar_lea.vmem %s1693_s6, 2048  ;;  %p1695_p8 = scmp.lt.s32.totalorder %s2384_s29, %s1693_s6 }
  0x44   : > { %v601_v46 = vrot.slane %v227_v40, %v488_v24  ;;  %v622_v47 = vrot.slane %v227_v40, %v1936_v26  ;;  %v615_v48 = vrot.slane %v227_v40, %v1939_v28  ;;  %v636_v50 = vrot.slane %v1964_v49, %v1917_v13  ;;  %p1691_p12 = pneg %p1690_p11  ;;  %p1696_p9 = scmp.lt.s32.totalorder %s1694_s7, %s1688_s23 }
  0x45   : > { %214 = vadd.xlane.f32.xlu1 %v199_v6  ;;  %212 = vadd.xlane.f32.xlu0 %v198_v7  ;;  %v629_v51 = vrot.slane %v1964_v49, %v1910_v10  ;;  %v650_v52 = vrot.slane %v1964_v49, %v1925_v18  ;;  %v643_v53 = vrot.slane %v1964_v49, %v474_v20  ;;  %vm1301_vm10 = vcmask 1047559  }
  0x46   : > { %v657_v54 = vrot.slane %v1964_v49, %v488_v24  ;;  %vm1360_vm11 = vcmask 15360   ;;  %p1697_p13 = por %p1696_p9, %p1695_p8 }
  0x48   : > { %p1698_p1 = pnand %p1697_p13, %p1691_p12 }
  0x56   : > { %239 = vbcast.lane.b32.xlu1 %v233_v12, 264 }
  0x5a   : > { %243 = vbcast.lane.b32.xlu1 %v233_v12, 272 }
  0x5b   : > { %235 = vbcast.lane.b32.xlu0 %v233_v12, 256 }
  0x5e   : > { %247 = vbcast.lane.b32.xlu1 %v233_v12, 280 }
  0x5f   : > { %254 = vbcast.lane.b32.xlu0 %v252_v15, 256 }
  0x62   : > { %258 = vbcast.lane.b32.xlu1 %v252_v15, 264 }
  0x63   : > { %262 = vbcast.lane.b32.xlu0 %v252_v15, 272 }
  0x66   : > { %266 = vbcast.lane.b32.xlu1 %v252_v15, 280 }
  0x67   : > { %463 = vbcast.lane.b32.xlu0 %v461_v17, 256 }
  0x6a   : > { %470 = vbcast.lane.b32.xlu1 %v468_v19, 256 }
  0x6b   : > { %484 = vbcast.lane.b32.xlu0 %v482_v21, 256 }
  0x6e   : > { %477 = vbcast.lane.b32.xlu1 %v475_v23, 256 }
  0x6f   : > { %498 = vbcast.lane.b32.xlu0 %v496_v25, 256 }
  0x72   : > { %491 = vbcast.lane.b32.xlu1 %v489_v27, 256 }
  0x73   : > { %512 = vbcast.lane.b32.xlu0 %v510_v29, 256 }
  0x76   : > { %505 = vbcast.lane.b32.xlu1 %v503_v30, 256 }
  0x77   : > { %526 = vbcast.lane.b32.xlu0 %v524_v32, 256 }
  0x7a   : > { %519 = vbcast.lane.b32.xlu1 %v517_v33, 256 }
  0x7b   : > { %540 = vbcast.lane.b32.xlu0 %v538_v34, 256 }
  0x7e   : > { %533 = vbcast.lane.b32.xlu1 %v531_v35, 256  ;;  %v671_v35 = vrot.slane %v1964_v49, %v1939_v28 }
  0x7f   : > { %554 = vbcast.lane.b32.xlu0 %v552_v36, 256 }
  0x82   : > { %547 = vbcast.lane.b32.xlu1 %v545_v37, 256  ;;  %v664_v37 = vrot.slane %v1964_v49, %v1931_v22 }
  0x83   : > { %568 = vbcast.lane.b32.xlu0 %v566_v38, 256  ;;  %v678_v38 = vrot.slane %v1964_v49, %v1936_v26 }
  0x86   : > { %561 = vbcast.lane.b32.xlu1 %v559_v39, 256 }
  0x87   : > { %582 = vbcast.lane.b32.xlu0 %v580_v41, 256 }
  0x8a   : > { %575 = vbcast.lane.b32.xlu1 %v573_v42, 256 }
  0x8b   : > { %596 = vbcast.lane.b32.xlu0 %v594_v43, 256 }
  0x8e   : > { %589 = vbcast.lane.b32.xlu1 %v587_v44, 256 }
  0x8f   : > { %610 = vbcast.lane.b32.xlu0 %v608_v45, 256 }
  0x92   : > { %603 = vbcast.lane.b32.xlu1 %v601_v46, 256 }
  0x93   : > { %624 = vbcast.lane.b32.xlu0 %v622_v47, 256 }
  0x96   : > { %617 = vbcast.lane.b32.xlu1 %v615_v48, 256 }
  0x97   : > { %638 = vbcast.lane.b32.xlu0 %v636_v50, 256 }
  0x9a   : > { %631 = vbcast.lane.b32.xlu1 %v629_v51, 256 }
  0x9b   : > { %652 = vbcast.lane.b32.xlu0 %v650_v52, 256 }
  0x9e   : > { %645 = vbcast.lane.b32.xlu1 %v643_v53, 256 }
  0xa2   : > { %659 = vbcast.lane.b32.xlu1 %v657_v54, 256 }
  0xc6   : > { %v205_v55 = vpop.xlane.xlu1 %204  ;;  %v201_v56 = vpop.xlane.xlu0 %200 }
  0xc7   : > { %v216_v63 = vmul.f32 0.0078125, %v201_v56  ;;  %v218_v5 = vmul.f32 0.0078125, %v205_v55 }
  0xca   : > { %v207_v57 = vpop.xlane.xlu1 %206  ;;  %v203_v58 = vpop.xlane.xlu0 %202 }
  0xcb   : > { %v217_v0 = vmul.f32 0.0078125, %v203_v58  ;;  %v219_v11 = vmul.f32 0.0078125, %v207_v57 }
  0xce   : > { %v211_v59 = vpop.xlane.xlu1 %210  ;;  %v209_v60 = vpop.xlane.xlu0 %208 }
  0xcf   : > { %v220_v19 = vmul.f32 0.0078125, %v209_v60  ;;  %v221_v24 = vmul.f32 0.0078125, %v211_v59 }
  0xd2   : > { %v215_v61 = vpop.xlane.xlu1 %214  ;;  %v213_v62 = vpop.xlane.xlu0 %212 }
  0xd3   : > { %v222_v25 = vmul.f32 0.0078125, %v213_v62  ;;  %v223_v30 = vmul.f32 0.0078125, %v215_v61 }
  0xd6   : > { %v240_v1 = vpop.permute.xlu1 %239  ;;  %v236_v2 = vpop.permute.xlu0 %235 }
  0xd7   : > { %v277_v3 = vmul.f32 %v240_v1, %v217_v0  ;;  %v276_v4 = vmul.f32 %v236_v2, %v216_v63  ;;  %v284_v21 = vmul.f32 %v236_v2, %v220_v19  ;;  %v285_v27 = vmul.f32 %v240_v1, %v221_v24 }
  0xd8   : > { %v357_v2 = vand.u32 127, %v230_v8 }
  0xd9   : > { %312 = vperm.xlu1 %1617, %v277_v3   ;;  %309 = vperm.xlu0 %1616, %v276_v4  }
  0xda   : > { %v244_v6 = vpop.permute.xlu1 %243  ;;  %v255_v7 = vpop.permute.xlu0 %254 }
  0xdb   : > { %v278_v10 = vmul.f32 %v244_v6, %v218_v5  ;;  %v280_v13 = vmul.f32 %v255_v7, %v216_v63  ;;  %v286_v29 = vmul.f32 %v244_v6, %v222_v25  ;;  %v288_v31 = vmul.f32 %v255_v7, %v220_v19 }
  0xdc   : > { %v369_v6 = vadd.s32 4294967280, %v357_v2  ;;  %v376_v7 = vadd.s32 4294967272, %v357_v2 }
  0xdd   : > { %315 = vperm.xlu1 %1617, %v278_v10  }
  0xde   : > { %v248_v12 = vpop.permute.xlu1 %247  ;;  %v263_v15 = vpop.permute.xlu0 %262 }
  0xdf   : > { %v279_v14 = vmul.f32 %v248_v12, %v219_v11  ;;  %v282_v17 = vmul.f32 %v263_v15, %v218_v5  ;;  %v287_v32 = vmul.f32 %v248_v12, %v223_v30  ;;  %v290_v33 = vmul.f32 %v263_v15, %v222_v25 }
  0xe0   : > { %v362_v5 = vadd.s32 4294967288, %v357_v2  ;;  %v2040_v12 = vsub.s32 %v357_v2, %v1907_v9  ;;  %v379_v15 = vsub.s32 %v376_v7, %v1907_v9 }
  0xe1   : > { %318 = vperm.xlu0 %1616, %v279_v14   ;;  %321 = vperm.xlu1 %1617, %v280_v13   ;;  %v372_v14 = vsub.s32 %v369_v6, %v1907_v9 }
  0xe2   : > { %v259_v16 = vpop.permute.xlu1 %258  ;;  %v1984_v41 = vpop.permute.xlu0 %463  ;;  %v365_v13 = vsub.s32 %v362_v5, %v1907_v9 }
  0xe3   : > { %v281_v18 = vmul.f32 %v259_v16, %v217_v0  ;;  %v289_v34 = vmul.f32 %v259_v16, %v221_v24 }
  0xe5   : > { %324 = vperm.xlu0 %1616, %v281_v18   ;;  %327 = vperm.xlu1 %1617, %v282_v17  }
  0xe6   : > { %v267_v20 = vpop.permute.xlu1 %266  ;;  %v1988_v28 = vpop.permute.xlu0 %484 }
  0xe7   : > { %v283_v23 = vmul.f32 %v267_v20, %v219_v11  ;;  %v291_v36 = vmul.f32 %v267_v20, %v223_v30 }
  0xe9   : > { %330 = vperm.xlu0 %1616, %v283_v23   ;;  %333 = vperm.xlu1 %1617, %v284_v21  }
  0xea   : > { %v1980_v39 = vpop.permute.xlu1 %470  ;;  %v1992_v44 = vpop.permute.xlu0 %498 }
  0xed   : > { %336 = vperm.xlu0 %1616, %v285_v27   ;;  %339 = vperm.xlu1 %1617, %v286_v29  }
  0xee   : > { %v1982_v40 = vpop.permute.xlu1 %477  ;;  %v1996_v45 = vpop.permute.xlu0 %512 }
  0xf1   : > { %342 = vperm.xlu0 %1616, %v287_v32   ;;  %345 = vperm.xlu1 %1617, %v288_v31  }
  0xf2   : > { %v1986_v42 = vpop.permute.xlu1 %491  ;;  %v2000_v46 = vpop.permute.xlu0 %526 }
  0xf5   : > { %348 = vperm.xlu0 %1616, %v289_v34   ;;  %351 = vperm.xlu1 %1617, %v290_v33  }
  0xf6   : > { %v1990_v43 = vpop.permute.xlu1 %505  ;;  %v2004_v48 = vpop.permute.xlu0 %540 }
  0xf9   : > { %354 = vperm.xlu0 %1616, %v291_v36   ;;  %673 = vbcast.lane.b32.xlu1 %v671_v35, 256 }
  0xfa   : > { %v1994_v22 = vpop.permute.xlu1 %519  ;;  %v2008_v50 = vpop.permute.xlu0 %554 }
  0xfd   : > { %666 = vbcast.lane.b32.xlu0 %v664_v37, 256 }
  0xfe   : > { %v1998_v26 = vpop.permute.xlu1 %533  ;;  %v2012_v52 = vpop.permute.xlu0 %568 }
 0x101   : > { %680 = vbcast.lane.b32.xlu0 %v678_v38, 256 }
 0x102   : > { %v2002_v47 = vpop.permute.xlu1 %547  ;;  %v2016_v54 = vpop.permute.xlu0 %582 }
 0x106   : > { %v2006_v49 = vpop.permute.xlu1 %561  ;;  %v2020_v56 = vpop.permute.xlu0 %596 }
 0x10a   : > { %v2010_v51 = vpop.permute.xlu1 %575  ;;  %v2024_v58 = vpop.permute.xlu0 %610 }
 0x10e   : > { %v2014_v53 = vpop.permute.xlu1 %589  ;;  %v2028_v60 = vpop.permute.xlu0 %624 }
 0x112   : > { %v2018_v55 = vpop.permute.xlu1 %603  ;;  %v2032_v62 = vpop.permute.xlu0 %638 }
 0x116   : > { %v2022_v57 = vpop.permute.xlu1 %617  ;;  %v2036_v0 = vpop.permute.xlu0 %652 }
 0x11a   : > { %v2026_v59 = vpop.permute.xlu1 %631 }
 0x11e   : > { %v2030_v61 = vpop.permute.xlu1 %645 }
 0x122   : > { %v2034_v63 = vpop.permute.xlu1 %659 }
 0x158   : > { %v313_v1 = vpop.permute.xlu1 %312  ;;  %v310_v3 = vpop.permute.xlu0 %309 }
 0x159   : > { %v366_v18 = vrot.slane %v313_v1, %v365_v13  ;;  %v361_v8 = vrot.slane %v310_v3, %v2040_v12 }
 0x15b   : > { %v368_v9 = vsel %vm367_vm0, %v366_v18, %v361_v8 }
 0x15c   : > { %v316_v4 = vpop.permute.xlu1 %315 }
 0x15d   : > { %v373_v21 = vrot.slane %v316_v4, %v372_v14 }
 0x15f   : > { %v375_v31 = vsel %vm374_vm1, %v373_v21, %v368_v9 }
 0x160   : > { %v322_v10 = vpop.permute.xlu1 %321  ;;  %v319_v11 = vpop.permute.xlu0 %318 }
 0x161   : > { %v386_v19 = vrot.slane %v322_v10, %v2040_v12  ;;  %v380_v24 = vrot.slane %v319_v11, %v379_v15 }
 0x163   : > { %v382_v33 = vsel %vm381_vm2, %v380_v24, %v375_v31 }
 0x164   : > { %v328_v16 = vpop.permute.xlu1 %327  ;;  %v325_v17 = vpop.permute.xlu0 %324 }
 0x165   : > { %v390_v20 = vrot.slane %v325_v17, %v365_v13  ;;  %v395_v23 = vrot.slane %v328_v16, %v372_v14 }
 0x167   : > { %v391_v25 = vsel %vm367_vm0, %v390_v20, %v386_v19 }
 0x168   : > { %v334_v27 = vpop.permute.xlu1 %333  ;;  %v331_v29 = vpop.permute.xlu0 %330  ;;  %v396_v32 = vsel %vm374_vm1, %v395_v23, %v391_v25 }
 0x169   : > { %v400_v30 = vrot.slane %v331_v29, %v379_v15  ;;  %v405_v6 = vrot.slane %v334_v27, %v2040_v12 }
 0x16b   : > { %v401_v34 = vsel %vm381_vm2, %v400_v30, %v396_v32 }
 0x16c   : > { %v340_v35 = vpop.permute.xlu1 %339  ;;  %v337_v36 = vpop.permute.xlu0 %336  ;;  %v441_v37 = vsel %vm440_vm3, %v401_v34, %v382_v33 }
 0x16d   : > { %v446_v38 = vsel %vm445_vm4, %v441_v37, 0.0  ;;  %v409_v3 = vrot.slane %v337_v36, %v365_v13  ;;  %v414_v11 = vrot.slane %v340_v35, %v372_v14 }
 0x16e   : > { %447 = vadd.xlane.f32.xlu1 %v446_v38 }
 0x16f   : > { %v410_v17 = vsel %vm367_vm0, %v409_v3, %v405_v6 }
 0x170   : > { %v346_v1 = vpop.permute.xlu1 %345  ;;  %v343_v2 = vpop.permute.xlu0 %342  ;;  %v415_v21 = vsel %vm374_vm1, %v414_v11, %v410_v17 }
 0x171   : > { %v424_v7 = vrot.slane %v346_v1, %v2040_v12  ;;  %v419_v18 = vrot.slane %v343_v2, %v379_v15 }
 0x173   : > { %v420_v24 = vsel %vm381_vm2, %v419_v18, %v415_v21 }
 0x174   : > { %v352_v4 = vpop.permute.xlu1 %351  ;;  %v349_v5 = vpop.permute.xlu0 %348 }
 0x175   : > { %v428_v10 = vrot.slane %v349_v5, %v365_v13  ;;  %v433_v16 = vrot.slane %v352_v4, %v372_v14 }
 0x177   : > { %v429_v8 = vsel %vm367_vm0, %v428_v10, %v424_v7 }
 0x178   : > { %v355_v19 = vpop.permute.xlu0 %354  ;;  %v434_v23 = vsel %vm374_vm1, %v433_v16, %v429_v8  ;;  %v2065_v14 = vpop.permute.xlu1 %673 }
 0x179   : > { %v438_v20 = vrot.slane %v355_v19, %v379_v15 }
 0x17b   : > { %v439_v25 = vsel %vm381_vm2, %v438_v20, %v434_v23 }
 0x17c   : > { %v442_v27 = vsel %vm440_vm3, %v439_v25, %v420_v24  ;;  %v2069_v30 = vpop.permute.xlu0 %666 }
 0x17d   : > { %v449_v13 = vsel %vm445_vm4, %v442_v27, 0.0 }
 0x17e   : > { %450 = vadd.xlane.f32.xlu0 %v449_v13 }
 0x180   : > { %v681_v34 = vpop.permute.xlu0 %680 }
 0x1fb   : > { %v448_v29 = vpop.xlane.xlu1 %447 }
 0x1fc   : > { %v2067_v9 = vmax.f32 %v448_v29, 0.0 }
 0x1fe   : > { %v714_v15 = vmul.f32 %v1984_v41, %v2067_v9  ;;  %v715_v31 = vmul.f32 %v1980_v39, %v2067_v9  ;;  %v716_v32 = vmul.f32 %v1982_v40, %v2067_v9  ;;  %v717_v33 = vmul.f32 %v1988_v28, %v2067_v9 }
 0x1ff   : > { %v2081_v35 = vmul.f32 %v2065_v14, %v2067_v9  ;;  %v2084_v36 = vmul.f32 %v681_v34, %v2067_v9  ;;  %v718_v37 = vmul.f32 %v1986_v42, %v2067_v9  ;;  %v719_v38 = vmul.f32 %v1992_v44, %v2067_v9 }
 0x200   : > { %843 = vperm.xlu1 %1617, %v714_v15   ;;  %846 = vperm.xlu0 %1616, %v715_v31   ;;  %v720_v1 = vmul.f32 %v1990_v43, %v2067_v9  ;;  %v721_v2 = vmul.f32 %v1996_v45, %v2067_v9  ;;  %v722_v3 = vmul.f32 %v1994_v22, %v2067_v9 }
 0x201   : > { %v723_v5 = vmul.f32 %v2000_v46, %v2067_v9  ;;  %v724_v7 = vmul.f32 %v1998_v26, %v2067_v9  ;;  %v725_v10 = vmul.f32 %v2004_v48, %v2067_v9  ;;  %v726_v16 = vmul.f32 %v2002_v47, %v2067_v9 }
 0x202   : > { %v727_v17 = vmul.f32 %v2008_v50, %v2067_v9  ;;  %v728_v18 = vmul.f32 %v2006_v49, %v2067_v9  ;;  %v729_v8 = vmul.f32 %v2012_v52, %v2067_v9  ;;  %v730_v19 = vmul.f32 %v2010_v51, %v2067_v9 }
 0x203   : > { %v731_v20 = vmul.f32 %v2016_v54, %v2067_v9  ;;  %v732_v21 = vmul.f32 %v2014_v53, %v2067_v9  ;;  %v733_v23 = vmul.f32 %v2020_v56, %v2067_v9  ;;  %v734_v24 = vmul.f32 %v2018_v55, %v2067_v9 }
 0x204   : > { %849 = vperm.xlu1 %1617, %v716_v32   ;;  %852 = vperm.xlu0 %1616, %v717_v33   ;;  %v735_v25 = vmul.f32 %v2024_v58, %v2067_v9  ;;  %v736_v27 = vmul.f32 %v2022_v57, %v2067_v9  ;;  %v737_v13 = vmul.f32 %v2028_v60, %v2067_v9 }
 0x205   : > { %v738_v29 = vmul.f32 %v2026_v59, %v2067_v9  ;;  %v739_v15 = vmul.f32 %v2032_v62, %v2067_v9  ;;  %v740_v31 = vmul.f32 %v2030_v61, %v2067_v9  ;;  %v741_v32 = vmul.f32 %v2036_v0, %v2067_v9 }
 0x208   : > { %855 = vperm.xlu1 %1617, %v718_v37   ;;  %858 = vperm.xlu0 %1616, %v719_v38  }
 0x20b   : > { %v451_v4 = vpop.xlane.xlu0 %450 }
 0x20c   : > { %861 = vperm.xlu1 %1617, %v720_v1   ;;  %864 = vperm.xlu0 %1616, %v721_v2   ;;  %v2098_v6 = vmax.f32 %v451_v4, 0.0 }
 0x20e   : > { %v2105_v11 = vmul.f32 %v681_v34, %v2098_v6  ;;  %v746_v33 = vmul.f32 %v1984_v41, %v2098_v6  ;;  %v747_v34 = vmul.f32 %v1980_v39, %v2098_v6  ;;  %v754_v37 = vmul.f32 %v1994_v22, %v2098_v6 }
 0x20f   : > { %v755_v38 = vmul.f32 %v2000_v46, %v2098_v6  ;;  %v762_v1 = vmul.f32 %v2010_v51, %v2098_v6  ;;  %v763_v2 = vmul.f32 %v2016_v54, %v2098_v6  ;;  %v770_v39 = vmul.f32 %v2026_v59, %v2098_v6 }
 0x210   : > { %867 = vperm.xlu1 %1617, %v722_v3   ;;  %870 = vperm.xlu0 %1616, %v723_v5   ;;  %v771_v41 = vmul.f32 %v2032_v62, %v2098_v6  ;;  %v748_v22 = vmul.f32 %v1982_v40, %v2098_v6  ;;  %v756_v46 = vmul.f32 %v1998_v26, %v2098_v6 }
 0x211   : > { %v764_v51 = vmul.f32 %v2014_v53, %v2098_v6  ;;  %v772_v54 = vmul.f32 %v2030_v61, %v2098_v6  ;;  %v749_v59 = vmul.f32 %v1988_v28, %v2098_v6  ;;  %v757_v62 = vmul.f32 %v2004_v48, %v2098_v6 }
 0x212   : > { %v765_v40 = vmul.f32 %v2020_v56, %v2098_v6  ;;  %v773_v26 = vmul.f32 %v2036_v0, %v2098_v6  ;;  %v742_v53 = vmul.f32 %v2034_v63, %v2067_v9  ;;  %v750_v61 = vmul.f32 %v1986_v42, %v2098_v6 }
 0x213   : > { %v758_v28 = vmul.f32 %v2002_v47, %v2098_v6  ;;  %v766_v48 = vmul.f32 %v2018_v55, %v2098_v6  ;;  %v774_v56 = vmul.f32 %v2034_v63, %v2098_v6  ;;  %v743_v0 = vmul.f32 %v2069_v30, %v2067_v9 }
 0x214   : > { %873 = vperm.xlu1 %1617, %v724_v7   ;;  %876 = vperm.xlu0 %1616, %v725_v10   ;;  %v751_v42 = vmul.f32 %v1992_v44, %v2098_v6  ;;  %v759_v3 = vmul.f32 %v2008_v50, %v2098_v6  ;;  %v767_v47 = vmul.f32 %v2024_v58, %v2098_v6 }
 0x215   : > { %v775_v55 = vmul.f32 %v2069_v30, %v2098_v6  ;;  %v752_v63 = vmul.f32 %v1990_v43, %v2098_v6  ;;  %v760_v44 = vmul.f32 %v2006_v49, %v2098_v6  ;;  %v768_v50 = vmul.f32 %v2022_v57, %v2098_v6 }
 0x216   : > { %v776_v58 = vmul.f32 %v2065_v14, %v2098_v6  ;;  %v753_v43 = vmul.f32 %v1996_v45, %v2098_v6  ;;  %v761_v9 = vmul.f32 %v2012_v52, %v2098_v6  ;;  %v769_v49 = vmul.f32 %v2028_v60, %v2098_v6 }
 0x218   : > { %879 = vperm.xlu1 %1617, %v726_v16   ;;  %882 = vperm.xlu0 %1616, %v727_v17  }
 0x21c   : > { %885 = vperm.xlu1 %1617, %v728_v18   ;;  %888 = vperm.xlu0 %1616, %v729_v8  }
 0x220   : > { %891 = vperm.xlu1 %1617, %v730_v19   ;;  %894 = vperm.xlu0 %1616, %v731_v20  }
 0x224   : > { %897 = vperm.xlu1 %1617, %v732_v21   ;;  %900 = vperm.xlu0 %1616, %v733_v23  }
 0x228   : > { %903 = vperm.xlu1 %1617, %v734_v24   ;;  %906 = vperm.xlu0 %1616, %v735_v25  }
 0x22c   : > { %909 = vperm.xlu1 %1617, %v736_v27   ;;  %912 = vperm.xlu0 %1616, %v737_v13  }
 0x230   : > { %915 = vperm.xlu1 %1617, %v738_v29   ;;  %918 = vperm.xlu0 %1616, %v739_v15  }
 0x234   : > { %921 = vperm.xlu1 %1617, %v740_v31   ;;  %924 = vperm.xlu0 %1616, %v741_v32  }
 0x238   : > { %939 = vperm.xlu1 %1617, %v746_v33   ;;  %942 = vperm.xlu0 %1616, %v747_v34  }
 0x23c   : > { %963 = vperm.xlu1 %1617, %v754_v37   ;;  %966 = vperm.xlu0 %1616, %v755_v38  }
 0x240   : > { %987 = vperm.xlu1 %1617, %v762_v1   ;;  %990 = vperm.xlu0 %1616, %v763_v2  }
 0x244   : > { %1011 = vperm.xlu1 %1617, %v770_v39   ;;  %1014 = vperm.xlu0 %1616, %v771_v41  }
 0x248   : > { %945 = vperm.xlu1 %1617, %v748_v22   ;;  %969 = vperm.xlu0 %1616, %v756_v46  }
 0x24c   : > { %993 = vperm.xlu1 %1617, %v764_v51   ;;  %1017 = vperm.xlu0 %1616, %v772_v54  }
 0x250   : > { %948 = vperm.xlu1 %1617, %v749_v59   ;;  %972 = vperm.xlu0 %1616, %v757_v62  }
 0x254   : > { %996 = vperm.xlu1 %1617, %v765_v40   ;;  %1020 = vperm.xlu0 %1616, %v773_v26  }
 0x258   : > { %927 = vperm.xlu1 %1617, %v742_v53   ;;  %951 = vperm.xlu0 %1616, %v750_v61  }
 0x25c   : > { %975 = vperm.xlu1 %1617, %v758_v28   ;;  %999 = vperm.xlu0 %1616, %v766_v48  }
 0x260   : > { %1023 = vperm.xlu1 %1617, %v774_v56   ;;  %930 = vperm.xlu0 %1616, %v743_v0  }
 0x264   : > { %954 = vperm.xlu1 %1617, %v751_v42   ;;  %978 = vperm.xlu0 %1616, %v759_v3  }
 0x268   : > { %1002 = vperm.xlu1 %1617, %v767_v47   ;;  %1026 = vperm.xlu0 %1616, %v775_v55  }
 0x26c   : > { %933 = vperm.xlu1 %1617, %v2081_v35   ;;  %957 = vperm.xlu0 %1616, %v752_v63  }
 0x270   : > { %981 = vperm.xlu1 %1617, %v760_v44   ;;  %1005 = vperm.xlu0 %1616, %v768_v50  }
 0x274   : > { %1029 = vperm.xlu1 %1617, %v776_v58   ;;  %936 = vperm.xlu0 %1616, %v2084_v36  }
 0x278   : > { %960 = vperm.xlu1 %1617, %v753_v43   ;;  %984 = vperm.xlu0 %1616, %v761_v9  }
 0x27c   : > { %1008 = vperm.xlu1 %1617, %v769_v49   ;;  %1032 = vperm.xlu0 %1616, %v2105_v11  }
 0x27f   : > { %v844_v57 = vpop.permute.xlu1 %843  ;;  %v847_v30 = vpop.permute.xlu0 %846 }
 0x280   : > { %v1037_v45 = vrot.slane %v844_v57, %v2040_v12  ;;  %v1041_v7 = vrot.slane %v847_v30, %v2040_v12 }
 0x282   : > { %v1290_v60 = vsel %vm440_vm3, %v1041_v7, %v1037_v45 }
 0x283   : > { %v850_v14 = vpop.permute.xlu1 %849  ;;  %v853_v35 = vpop.permute.xlu0 %852 }
 0x284   : > { %v1045_v10 = vrot.slane %v850_v14, %v2040_v12  ;;  %v1049_v6 = vrot.slane %v853_v35, %v2040_v12 }
 0x286   : > { %v1292_v17 = vsel %vm1291_vm5, %v1045_v10, %v1290_v60 }
 0x287   : > { %v856_v4 = vpop.permute.xlu1 %855  ;;  %v859_v36 = vpop.permute.xlu0 %858  ;;  %v1294_v21 = vsel %vm1293_vm6, %v1049_v6, %v1292_v17 }
 0x288   : > { %v1053_v18 = vrot.slane %v856_v4, %v2040_v12  ;;  %v1057_v23 = vrot.slane %v859_v36, %v2040_v12 }
 0x28a   : > { %v1296_v27 = vsel %vm1295_vm7, %v1053_v18, %v1294_v21 }
 0x28b   : > { %v862_v5 = vpop.permute.xlu1 %861  ;;  %v865_v52 = vpop.permute.xlu0 %864  ;;  %v1298_v33 = vsel %vm1297_vm8, %v1057_v23, %v1296_v27 }
 0x28c   : > { %v1061_v13 = vrot.slane %v862_v5, %v2040_v12  ;;  %v1065_v34 = vrot.slane %v865_v52, %v2040_v12 }
 0x28e   : > { %v1300_v39 = vsel %vm1299_vm9, %v1061_v13, %v1298_v33 }
 0x28f   : > { %v868_v16 = vpop.permute.xlu1 %867  ;;  %v871_v11 = vpop.permute.xlu0 %870  ;;  %v1302_v54 = vsel %vm1301_vm10, %v1065_v34, %v1300_v39 }
 0x290   : > { %v1069_v8 = vrot.slane %v868_v16, %v2040_v12  ;;  %v1073_v19 = vrot.slane %v871_v11, %v2040_v12  ;;  %v1361_v53 = vsel %vm1360_vm11, %v1302_v54, 0.0 }
 0x292   : > { %v1303_v29 = vsel %vm440_vm3, %v1073_v19, %v1069_v8 }
 0x293   : > { %v874_v20 = vpop.permute.xlu1 %873  ;;  %v877_v25 = vpop.permute.xlu0 %876 }
 0x294   : > { %v1077_v24 = vrot.slane %v874_v20, %v2040_v12  ;;  %v1081_v15 = vrot.slane %v877_v25, %v2040_v12 }
 0x296   : > { %v1304_v31 = vsel %vm1291_vm5, %v1077_v24, %v1303_v29 }
 0x297   : > { %v880_v32 = vpop.permute.xlu1 %879  ;;  %v883_v38 = vpop.permute.xlu0 %882  ;;  %v1305_v1 = vsel %vm1293_vm6, %v1081_v15, %v1304_v31 }
 0x298   : > { %v1085_v37 = vrot.slane %v880_v32, %v2040_v12  ;;  %v1089_v2 = vrot.slane %v883_v38, %v2040_v12 }
 0x29a   : > { %v1306_v41 = vsel %vm1295_vm7, %v1085_v37, %v1305_v1 }
 0x29b   : > { %v886_v22 = vpop.permute.xlu1 %885  ;;  %v889_v51 = vpop.permute.xlu0 %888  ;;  %v1307_v59 = vsel %vm1297_vm8, %v1089_v2, %v1306_v41 }
 0x29c   : > { %v1093_v46 = vrot.slane %v886_v22, %v2040_v12  ;;  %v1097_v62 = vrot.slane %v889_v51, %v2040_v12 }
 0x29e   : > { %v1308_v40 = vsel %vm1299_vm9, %v1093_v46, %v1307_v59 }
 0x29f   : > { %v892_v26 = vpop.permute.xlu1 %891  ;;  %v1309_v61 = vsel %vm1301_vm10, %v1097_v62, %v1308_v40  ;;  %v895_v28 = vpop.permute.xlu0 %894 }
 0x2a0   : > { %1362 = vadd.xlane.f32.xlu1 %v1361_v53  ;;  %v1364_v48 = vsel %vm1360_vm11, %v1309_v61, 0.0  ;;  %v1101_v56 = vrot.slane %v892_v26, %v2040_v12  ;;  %v1105_v0 = vrot.slane %v895_v28, %v2040_v12 }
 0x2a1   : > { %1365 = vadd.xlane.f32.xlu0 %v1364_v48 }
 0x2a2   : > { %v1310_v55 = vsel %vm440_vm3, %v1105_v0, %v1101_v56 }
 0x2a3   : > { %v898_v42 = vpop.permute.xlu1 %897  ;;  %v901_v47 = vpop.permute.xlu0 %900 }
 0x2a4   : > { %v1109_v3 = vrot.slane %v898_v42, %v2040_v12  ;;  %v1113_v63 = vrot.slane %v901_v47, %v2040_v12 }
 0x2a6   : > { %v1311_v44 = vsel %vm1291_vm5, %v1109_v3, %v1310_v55 }
 0x2a7   : > { %v904_v50 = vpop.permute.xlu1 %903  ;;  %v907_v43 = vpop.permute.xlu0 %906  ;;  %v1312_v9 = vsel %vm1293_vm6, %v1113_v63, %v1311_v44 }
 0x2a8   : > { %v1117_v58 = vrot.slane %v904_v50, %v2040_v12  ;;  %v1121_v49 = vrot.slane %v907_v43, %v2040_v12 }
 0x2aa   : > { %v1313_v57 = vsel %vm1295_vm7, %v1117_v58, %v1312_v9 }
 0x2ab   : > { %v910_v30 = vpop.permute.xlu1 %909  ;;  %v913_v35 = vpop.permute.xlu0 %912  ;;  %v1314_v4 = vsel %vm1297_vm8, %v1121_v49, %v1313_v57 }
 0x2ac   : > { %v1125_v14 = vrot.slane %v910_v30, %v2040_v12  ;;  %v1129_v36 = vrot.slane %v913_v35, %v2040_v12 }
 0x2ae   : > { %v1315_v5 = vsel %vm1299_vm9, %v1125_v14, %v1314_v4 }
 0x2af   : > { %v916_v45 = vpop.permute.xlu1 %915  ;;  %v1316_v7 = vsel %vm1301_vm10, %v1129_v36, %v1315_v5  ;;  %v919_v52 = vpop.permute.xlu0 %918 }
 0x2b0   : > { %v1367_v10 = vsel %vm1360_vm11, %v1316_v7, 0.0  ;;  %v1133_v41 = vrot.slane %v916_v45, %v2040_v12  ;;  %v1137_v22 = vrot.slane %v919_v52, %v2040_v12 }
 0x2b1   : > { %1368 = vadd.xlane.f32.xlu0 %v1367_v10 }
 0x2b2   : > { %v1317_v59 = vsel %vm440_vm3, %v1137_v22, %v1133_v41 }
 0x2b3   : > { %v922_v16 = vpop.permute.xlu1 %921  ;;  %v925_v60 = vpop.permute.xlu0 %924 }
 0x2b4   : > { %v1141_v46 = vrot.slane %v922_v16, %v2040_v12  ;;  %v1145_v40 = vrot.slane %v925_v60, %v2040_v12 }
 0x2b6   : > { %v1318_v62 = vsel %vm1291_vm5, %v1141_v46, %v1317_v59 }
 0x2b7   : > { %v940_v6 = vpop.permute.xlu1 %939  ;;  %v943_v11 = vpop.permute.xlu0 %942  ;;  %v1319_v50 = vsel %vm1293_vm6, %v1145_v40, %v1318_v62 }
 0x2b8   : > { %v1165_v26 = vrot.slane %v940_v6, %v2040_v12  ;;  %v1169_v61 = vrot.slane %v943_v11, %v2040_v12 }
 0x2ba   : > { %v1324_v49 = vsel %vm440_vm3, %v1169_v61, %v1165_v26 }
 0x2bb   : > { %v964_v17 = vpop.permute.xlu1 %963  ;;  %v967_v18 = vpop.permute.xlu0 %966 }
 0x2bc   : > { %v1197_v28 = vrot.slane %v964_v17, %v2040_v12  ;;  %v1201_v48 = vrot.slane %v967_v18, %v2040_v12 }
 0x2be   : > { %v1331_v57 = vsel %vm440_vm3, %v1201_v48, %v1197_v28 }
 0x2bf   : > { %v988_v8 = vpop.permute.xlu1 %987  ;;  %v991_v19 = vpop.permute.xlu0 %990 }
 0x2c0   : > { %v1229_v56 = vrot.slane %v988_v8, %v2040_v12  ;;  %v1233_v42 = vrot.slane %v991_v19, %v2040_v12 }
 0x2c2   : > { %v1338_v4 = vsel %vm440_vm3, %v1233_v42, %v1229_v56 }
 0x2c3   : > { %v1012_v20 = vpop.permute.xlu1 %1011  ;;  %v1015_v21 = vpop.permute.xlu0 %1014 }
 0x2c4   : > { %v1261_v3 = vrot.slane %v1012_v20, %v2040_v12  ;;  %v1265_v47 = vrot.slane %v1015_v21, %v2040_v12 }
 0x2c6   : > { %v1345_v36 = vsel %vm440_vm3, %v1265_v47, %v1261_v3 }
 0x2c7   : > { %v946_v23 = vpop.permute.xlu1 %945  ;;  %v970_v24 = vpop.permute.xlu0 %969 }
 0x2c8   : > { %v1173_v55 = vrot.slane %v946_v23, %v2040_v12  ;;  %v1205_v63 = vrot.slane %v970_v24, %v2040_v12 }
 0x2ca   : > { %v1325_v5 = vsel %vm1291_vm5, %v1173_v55, %v1324_v49  ;;  %v1332_v7 = vsel %vm1291_vm5, %v1205_v63, %v1331_v57 }
 0x2cb   : > { %v994_v25 = vpop.permute.xlu1 %993  ;;  %v1018_v27 = vpop.permute.xlu0 %1017 }
 0x2cc   : > { %v1237_v44 = vrot.slane %v994_v25, %v2040_v12  ;;  %v1269_v58 = vrot.slane %v1018_v27, %v2040_v12 }
 0x2ce   : > { %v1339_v52 = vsel %vm1291_vm5, %v1237_v44, %v1338_v4  ;;  %v1346_v60 = vsel %vm1291_vm5, %v1269_v58, %v1345_v36 }
 0x2cf   : > { %v949_v13 = vpop.permute.xlu1 %948  ;;  %v973_v29 = vpop.permute.xlu0 %972 }
 0x2d0   : > { %v1177_v43 = vrot.slane %v949_v13, %v2040_v12  ;;  %v1209_v30 = vrot.slane %v973_v29, %v2040_v12 }
 0x2d2   : > { %v1326_v6 = vsel %vm1293_vm6, %v1177_v43, %v1325_v5  ;;  %v1333_v8 = vsel %vm1293_vm6, %v1209_v30, %v1332_v7 }
 0x2d3   : > { %v2256_v15 = vpop.permute.xlu1 %996  ;;  %v2258_v31 = vpop.permute.xlu0 %1020 }
 0x2d4   : > { %v1241_v19 = vrot.slane %v2256_v15, %v2040_v12  ;;  %v1273_v24 = vrot.slane %v2258_v31, %v2040_v12 }
 0x2d6   : > { %v1347_v48 = vsel %vm1293_vm6, %v1273_v24, %v1346_v60 }
 0x2d7   : > { %v928_v32 = vpop.permute.xlu1 %927  ;;  %v952_v33 = vpop.permute.xlu0 %951 }
 0x2d8   : > { %v1149_v14 = vrot.slane %v928_v32, %v2040_v12  ;;  %v1181_v10 = vrot.slane %v952_v33, %v2040_v12 }
 0x2da   : > { %v1320_v20 = vsel %vm1295_vm7, %v1149_v14, %v1319_v50  ;;  %v1327_v29 = vsel %vm1295_vm7, %v1181_v10, %v1326_v6 }
 0x2db   : > { %v2260_v34 = vpop.permute.xlu1 %975  ;;  %v2262_v37 = vpop.permute.xlu0 %999 }
 0x2dc   : > { %v1213_v11 = vrot.slane %v2260_v34, %v2040_v12  ;;  %v1245_v15 = vrot.slane %v2262_v37, %v2040_v12 }
 0x2de   : > { %v1334_v34 = vsel %vm1295_vm7, %v1213_v11, %v1333_v8  ;;  %v1650_v11 = vld [vmem:[%s1892_s11] sm:$0xff] }
 0x2df   : > { %v2264_v38 = vpop.permute.xlu1 %1023  ;;  %v931_v1 = vpop.permute.xlu0 %930 }
 0x2e0   : > { %v1153_v45 = vrot.slane %v931_v1, %v2040_v12  ;;  %v1277_v31 = vrot.slane %v2264_v38, %v2040_v12 }
 0x2e2   : > { %v1321_v25 = vsel %vm1297_vm8, %v1153_v45, %v1320_v20  ;;  %v1348_v3 = vsel %vm1295_vm7, %v1277_v31, %v1347_v48  ;;  %v1654_v48 = vld [vmem:[%s1892_s11 + $0x20] sm:$0xff] }
 0x2e3   : > { %v955_v2 = vpop.permute.xlu1 %954  ;;  %v2266_v39 = vpop.permute.xlu0 %978 }
 0x2e4   : > { %v1185_v17 = vrot.slane %v955_v2, %v2040_v12  ;;  %v1217_v21 = vrot.slane %v2266_v39, %v2040_v12 }
 0x2e6   : > { %v1328_v1 = vsel %vm1297_vm8, %v1185_v17, %v1327_v29  ;;  %v1335_v41 = vsel %vm1297_vm8, %v1217_v21, %v1334_v34 }
 0x2e7   : > { %v2271_v51 = vpop.permute.xlu1 %1002  ;;  %v2273_v54 = vpop.permute.xlu0 %1026 }
 0x2e8   : > { %v1249_v22 = vrot.slane %v2271_v51, %v2040_v12  ;;  %v1281_v62 = vrot.slane %v2273_v54, %v2040_v12 }
 0x2ea   : > { %v1349_v50 = vsel %vm1297_vm8, %v1281_v62, %v1348_v3 }
 0x2eb   : > { %v934_v53 = vpop.permute.xlu1 %933  ;;  %v958_v0 = vpop.permute.xlu0 %957 }
 0x2ec   : > { %v1157_v16 = vrot.slane %v934_v53, %v2040_v12  ;;  %v1189_v27 = vrot.slane %v958_v0, %v2040_v12  ;;  %v1340_v53 = vsel %vm1293_vm6, %v1241_v19, %v1339_v52 }
 0x2ed   : > { %v1341_v56 = vsel %vm1295_vm7, %v1245_v15, %v1340_v53  ;;  %v1653_v53 = vld [vmem:[%s1892_s11 + $0x18] sm:$0xff] }
 0x2ee   : > { %v1322_v33 = vsel %vm1299_vm9, %v1157_v16, %v1321_v25  ;;  %v1329_v26 = vsel %vm1299_vm9, %v1189_v27, %v1328_v1  ;;  %v1342_v47 = vsel %vm1297_vm8, %v1249_v22, %v1341_v56 }
 0x2ef   : > { %v982_v9 = vpop.permute.xlu1 %981  ;;  %v1006_v35 = vpop.permute.xlu0 %1005 }
 0x2f0   : > { %v1221_v32 = vrot.slane %v982_v9, %v2040_v12  ;;  %v1253_v38 = vrot.slane %v1006_v35, %v2040_v12 }
 0x2f2   : > { %v1336_v28 = vsel %vm1299_vm9, %v1221_v32, %v1335_v41  ;;  %v1343_v43 = vsel %vm1299_vm9, %v1253_v38, %v1342_v47  ;;  %v1656_v47 = vld [vmem:[%s1892_s11 + $0x30] sm:$0xff] }
 0x2f3   : > { %v1030_v18 = vpop.permute.xlu1 %1029  ;;  %v937_v23 = vpop.permute.xlu0 %936 }
 0x2f4   : > { %v1161_v13 = vrot.slane %v937_v23, %v2040_v12  ;;  %v1285_v61 = vrot.slane %v1030_v18, %v2040_v12  ;;  %v1651_v18 = vld [vmem:[%s1892_s11 + $0x8] sm:$0xff]  ;;  %v1652_v23 = vld [vmem:[%s1892_s11 + $0x10] sm:$0xff] }
 0x2f6   : > { %v1323_v39 = vsel %vm1301_vm10, %v1161_v13, %v1322_v33  ;;  %v1350_v49 = vsel %vm1299_vm9, %v1285_v61, %v1349_v50 }
 0x2f7   : > { %v961_v2 = vpop.permute.xlu1 %960  ;;  %v985_v46 = vpop.permute.xlu0 %984  ;;  %v1370_v59 = vsel %vm1360_vm11, %v1323_v39, 0.0 }
 0x2f8   : > { %v1193_v37 = vrot.slane %v961_v2, %v2040_v12  ;;  %v1225_v40 = vrot.slane %v985_v46, %v2040_v12  ;;  %1371 = vadd.xlane.f32.xlu0 %v1370_v59 }
 0x2fa   : > { %v1330_v51 = vsel %vm1301_vm10, %v1193_v37, %v1329_v26  ;;  %v1337_v42 = vsel %vm1301_vm10, %v1225_v40, %v1336_v28 }
 0x2fb   : > { %v1009_v54 = vpop.permute.xlu1 %1008  ;;  %v1373_v0 = vsel %vm1360_vm11, %v1330_v51, 0.0  ;;  %v1033_v63 = vpop.permute.xlu0 %1032  ;;  %v1376_v44 = vsel %vm1360_vm11, %v1337_v42, 0.0 }
 0x2fc   : > { %v1257_v55 = vrot.slane %v1009_v54, %v2040_v12  ;;  %1374 = vadd.xlane.f32.xlu1 %v1373_v0  ;;  %v1289_v58 = vrot.slane %v1033_v63, %v2040_v12  ;;  %1377 = vadd.xlane.f32.xlu0 %v1376_v44  ;;  %v1655_v54 = vld [vmem:[%s1892_s11 + $0x28] sm:$0xff]  ;;  %v1657_v63 = vld [vmem:[%s1892_s11 + $0x38] sm:$0xff] }
 0x2fe   : > { %v1344_v9 = vsel %vm1301_vm10, %v1257_v55, %v1343_v43  ;;  %v1351_v30 = vsel %vm1301_vm10, %v1289_v58, %v1350_v49 }
 0x2ff   : > { %v1379_v57 = vsel %vm1360_vm11, %v1344_v9, 0.0  ;;  %v1382_v14 = vsel %vm1360_vm11, %v1351_v30, 0.0 }
 0x300   : > { %1380 = vadd.xlane.f32.xlu1 %v1379_v57  ;;  %1383 = vadd.xlane.f32.xlu0 %v1382_v14 }
 0x32d   : > { %v1363_v35 = vpop.xlane.xlu1 %1362 }
 0x32e   : > { %v1547_v4 = vmul.f32 -1.442695, %v1363_v35  ;;  %v1366_v36 = vpop.xlane.xlu0 %1365 }
 0x32f   : > { %v1548_v12 = vmul.f32 -1.442695, %v1366_v36 }
 0x330   : > { %1618 = vpow2.f32 %v1547_v4 }
 0x331   : > { %1620 = vpow2.f32 %v1548_v12 }
 0x33a   : > { %v1619_v5 = vpop.eup %1618 }
 0x33b   : > { %v1621_v45 = vpop.eup %1620  ;;  %v1409_v7 = vadd.f32 1.0, %v1619_v5 }
 0x33c   : > { %v1410_v52 = vadd.f32 1.0, %v1621_v45 }
 0x33d   : > { %1622 = vrcp.f32 %v1409_v7 }
 0x33e   : > { %1624 = vrcp.f32 %v1410_v52  ;;  %v1369_v10 = vpop.xlane.xlu0 %1368 }
 0x33f   : > { %v1549_v16 = vmul.f32 -1.442695, %v1369_v10 }
 0x341   : > { %1626 = vpow2.f32 %v1549_v16 }
 0x347   : > { %v1623_v60 = vpop.eup %1622 }
 0x348   : > { %v1625_v6 = vpop.eup %1624  ;;  %v1433_v17 = vmul.f32 %v1650_v11, %v1623_v60 }
 0x349   : > { %v1434_v8 = vmul.f32 %v1651_v18, %v1625_v6 }
 0x34a   : > { %1441 = vst [vmem:[%s2364_s27] sm:$0xff] %v1433_v17 }
 0x34b   : > { %v1627_v19 = vpop.eup %1626  ;;  %1442 = vst [vmem:[%s2364_s27 + $0x8] sm:$0xff] %v1434_v8 }
 0x34c   : > { %v1411_v20 = vadd.f32 1.0, %v1627_v19 }
 0x34e   : > { %1628 = vrcp.f32 %v1411_v20 }
 0x358   : > { %v1629_v21 = vpop.eup %1628 }
 0x359   : > { %v1435_v24 = vmul.f32 %v1652_v23, %v1629_v21 }
 0x35b   : > { %1443 = vst [vmem:[%s2364_s27 + $0x10] sm:$0xff] %v1435_v24 }
 0x385   : > { %v1372_v25 = vpop.xlane.xlu0 %1371 }
 0x386   : > { %v1550_v27 = vmul.f32 -1.442695, %v1372_v25 }
 0x388   : > { %1630 = vpow2.f32 %v1550_v27 }
 0x389   : > { %v1375_v13 = vpop.xlane.xlu1 %1374  ;;  %v1378_v15 = vpop.xlane.xlu0 %1377 }
 0x38a   : > { %v1551_v29 = vmul.f32 -1.442695, %v1375_v13  ;;  %v1552_v32 = vmul.f32 -1.442695, %v1378_v15 }
 0x38c   : > { %1632 = vpow2.f32 %v1551_v29 }
 0x38d   : > { %1634 = vpow2.f32 %v1552_v32  ;;  %v1381_v33 = vpop.xlane.xlu1 %1380  ;;  %v1384_v31 = vpop.xlane.xlu0 %1383 }
 0x38e   : > { %v1553_v34 = vmul.f32 -1.442695, %v1381_v33  ;;  %v1554_v1 = vmul.f32 -1.442695, %v1384_v31 }
 0x390   : > { %1636 = vpow2.f32 %v1553_v34 }
 0x391   : > { %1638 = vpow2.f32 %v1554_v1 }
 0x392   : > { %v1631_v2 = vpop.eup %1630 }
 0x393   : > { %v1412_v39 = vadd.f32 1.0, %v1631_v2 }
 0x395   : > { %1640 = vrcp.f32 %v1412_v39 }
 0x396   : > { %v1633_v41 = vpop.eup %1632 }
 0x397   : > { %v1635_v22 = vpop.eup %1634  ;;  %v1413_v37 = vadd.f32 1.0, %v1633_v41 }
 0x398   : > { %v1414_v46 = vadd.f32 1.0, %v1635_v22 }
 0x399   : > { %1642 = vrcp.f32 %v1413_v37 }
 0x39a   : > { %v1637_v59 = vpop.eup %1636  ;;  %1644 = vrcp.f32 %v1414_v46 }
 0x39b   : > { %v1639_v62 = vpop.eup %1638  ;;  %v1415_v38 = vadd.f32 1.0, %v1637_v59 }
 0x39c   : > { %v1416_v40 = vadd.f32 1.0, %v1639_v62 }
 0x39d   : > { %1646 = vrcp.f32 %v1415_v38 }
 0x39e   : > { %1648 = vrcp.f32 %v1416_v40 }
 0x39f   : > { %v1641_v26 = vpop.eup %1640 }
 0x3a0   : > { %v1436_v61 = vmul.f32 %v1653_v53, %v1641_v26 }
 0x3a2   : > { %1444 = vst [vmem:[%s2364_s27 + $0x18] sm:$0xff] %v1436_v61 }
 0x3a3   : > { %v1643_v51 = vpop.eup %1642 }
 0x3a4   : > { %v1645_v28 = vpop.eup %1644  ;;  %v1437_v56 = vmul.f32 %v1654_v48, %v1643_v51 }
 0x3a5   : > { %v1438_v0 = vmul.f32 %v1655_v54, %v1645_v28 }
 0x3a6   : > { %1445 = vst [vmem:[%s2364_s27 + $0x20] sm:$0xff] %v1437_v56 }
 0x3a7   : > { %v1647_v42 = vpop.eup %1646  ;;  %1446 = vst [vmem:[%s2364_s27 + $0x28] sm:$0xff] %v1438_v0 }
 0x3a8   : > { %v1649_v3 = vpop.eup %1648  ;;  %v1439_v55 = vmul.f32 %v1656_v47, %v1647_v42 }
 0x3a9   : > { %v1440_v44 = vmul.f32 %v1657_v63, %v1649_v3 }
 0x3aa   : > { %1447 = vst [vmem:[%s2364_s27 + $0x30] sm:$0xff] %v1439_v55 }
 0x3ab   : > { %1448 = vst [vmem:[%s2364_s27 + $0x38] sm:$0xff] %v1440_v44 }
 0x3ac   : > { %1701 = shalt.err (!%p1698_p1)
}
 0x3ad   : > { %s1702_s11 = scalar_lea.hbm %s2382_s10, 1024  ;;  %s1706_s19 = scalar_lea.hbm %s2433_s3, 8192 }
 0x3ae   : > { %p1703_p3 = scmp.ne.s32.totalorder %s2382_s10, %s1702_s11  ;;  %p1707_p0 = scmp.lt.u32.totalorder %s2382_s10, %s2433_s3 }
 0x3af   : > { %p1708_p2 = scmp.lt.u32.totalorder %s1706_s19, %s1702_s11  ;;  %p1710_p6 = scmp.lt.u32.totalorder %s1702_s11, %s2382_s10 }
 0x3b0   : > { %p1704_p4 = pnand %p1703_p3, %p2440_p10 }
 0x3b1   : > { %p1709_p7 = por %p1708_p2, %p1707_p0 }
 0x3b2   : > { %p1705_p5 = pneg %p1704_p4 }
 0x3b3   : > { %p1711_p11 = por %p1710_p6, %p1709_p7 }
 0x3b5   : > { %p1712_p12 = pnand %p1711_p11, %p1705_p5 }
 0x3b7   : > { %1715 = shalt.err (!%p1712_p12)
}
 0x3b8   : > { %s1761_s26 = smov 128   ;;  %s1762_s27 = smov 8  }
 0x3b9   : > { %1567 = dma.vmem_to_hbm [thread:$0]  (%p2440_p10), %s2384_s29, 1024, %s2382_s10, %s1450_s16, %s1761_s26, %s1761_s26, %s1762_s27  }
 0x3ba PF: > { %p1578_p8 = scmp.ge.s32.totalorder %s1754_s15, 2  ;;  %s1479_s28 = sand.u32 1, %s1742_s12  }
 0x3bb   : > { %p2441_p9 = scmp.ne.s32.totalorder %s2438_s25, 0  ;;  %s1480_s30 = scalar_lea.sflag [#allocation4], %s1479_s28 }
 0x3bd   : > { %p1574_p13 = pnand %p1578_p8, %p2441_p9 }
 0x3bf   : > { %1737 = dma.done.wait (!%p1574_p13), %s1480_s30, 1024  }
 0x3c0   : > { %1739 = vsyncadd (!%p1574_p13), %s1480_s30, 4294966272  ;;  %p16_p1 = scmp.ge.s32.totalorder %s1808_s18, 10   ;;  %s2442_s12 = smov %s1746_s13 }
 0x3c1   : > { %s2443_s13 = smov %s1750_s14  ;;  %s2444_s14 = smov %s1820_s21 }
 0x3c2   : > { %s2445_s15 = smov %s1808_s18  ;;  %18 = sbr.rel (!%p16_p1) target bundleno = 5 (0x5), region = 77 }
 0x3c9   :  { %1485 = vsyncpa [#allocation3], 1 }
 0x3ca   :  { %1487 = vsyncpa [#allocation3 + $0x1], 1 }
 0x3cb   :  { %1488 = vsyncpa [#allocation4], 1 }
 0x3cc   :  { %1490 = vsyncpa [#allocation4 + $0x1], 1 }

</bundles_post_ra>
